<compile_context>
chip_gen: v7x
topology: tpu7x:2x2x1
jax: 0.10.0
libtpu: 0.0.40
codegen_flags: <defaults>
</compile_context>

<pallas_src>
import math

import jax
import jax.numpy as jnp
from jax.experimental import pallas as pl
from jax.experimental.pallas import tpu as pltpu


# ---------------------------------------------------------------------------
# rope init (glue, plain JAX) — "llama3" rope type as used by MllamaTextConfig
# ---------------------------------------------------------------------------
def llama3_rope_init(head_dim, rope_theta, factor, low_freq_factor,
                     high_freq_factor, original_max_position_embeddings):
    inv_freq = 1.0 / (
        rope_theta ** (jnp.arange(0, head_dim, 2, dtype=jnp.float32) / head_dim)
    )
    low_freq_wavelen = original_max_position_embeddings / low_freq_factor
    high_freq_wavelen = original_max_position_embeddings / high_freq_factor
    wavelen = 2.0 * math.pi / inv_freq

    inv_freq_llama = jnp.where(wavelen > low_freq_wavelen, inv_freq / factor, inv_freq)
    smooth = (original_max_position_embeddings / wavelen - low_freq_factor) / (
        high_freq_factor - low_freq_factor
    )
    smoothed = (1.0 - smooth) / factor * inv_freq + smooth * inv_freq
    is_medium = (wavelen >= high_freq_wavelen) & (wavelen <= low_freq_wavelen)
    inv_freq_llama = jnp.where(is_medium, smoothed, inv_freq_llama)
    attention_scaling = 1.0  # llama3 rope does not rescale cos/sin
    return inv_freq_llama, attention_scaling


def _round_up(x, m):
    return ((x + m - 1) // m) * m


def _device_vmem_bytes():
    """Device VMEM capacity; conservative (v7x-sized) fallback if unknown."""
    try:
        return int(pltpu.get_tpu_info().vmem_capacity_bytes)
    except Exception:
        return 64 * 1024 * 1024


# ---------------------------------------------------------------------------
# Pallas kernel
# ---------------------------------------------------------------------------
def _make_rope_kernel(attention_scaling):
    scale = float(attention_scaling)

    def rope_kernel(pos_ref, inv_ref, cos_ref, sin_ref):
        # pos_ref: (blk, 1) float32           -- positions as a column block
        # inv_ref: (1, head_dim) float32      -- inv_freq duplicated across halves
        # cos_ref / sin_ref: (blk, head_dim) in output dtype
        pos = pos_ref[...]                     # (blk, 1)
        inv = inv_ref[...]                     # (1, head_dim)
        # VPU broadcast multiply: freqs[s, d] = pos[s] * inv_full[d]
        freqs = pos * inv                      # (blk, head_dim), full lane width
        cos_f = jnp.cos(freqs)
        sin_f = jnp.sin(freqs)
        if scale != 1.0:                       # trace-time guard: skip dead work
            cos_f = cos_f * scale
            sin_f = sin_f * scale
        # Single lane-dense full-width store per output (no concat, no masks
        # beyond the automatic partial-last-block masking).
        cos_ref[...] = cos_f.astype(cos_ref.dtype)
        sin_ref[...] = sin_f.astype(sin_ref.dtype)

    return rope_kernel


def mllama_rotary_embedding(x, position_ids, inv_freq, attention_scaling,
                            *, block_rows=None):
    """Pallas implementation of MllamaRotaryEmbedding.forward.

    x:            (B, S, hidden) — dtype source only
    position_ids: (B, S) int32
    inv_freq:     (head_dim // 2,) float32
    returns (cos, sin), each (B, S, head_dim) in x.dtype
    """
    B, S = position_ids.shape
    half = inv_freq.shape[0]
    head_dim = 2 * half
    out_dtype = x.dtype
    out_itemsize = jnp.dtype(out_dtype).itemsize

    # Sublane packing for the output dtype: 8 rows for 4-byte, 16 for 2-byte,
    # 32 for 1-byte elements.
    sublane = 8 * max(1, 4 // out_itemsize)

    rows = B * S

    # --- pick the row-block size -------------------------------------------
    device_vmem = _device_vmem_bytes()

    # Keep the double-buffered outputs (2 outputs x 2 buffers) within ~1/8 of
    # VMEM: ~8192 rows f32 on v5e/v6e (128 MiB), ~4096 on v7x (64 MiB).
    per_row_out_bytes = 2 * 2 * head_dim * out_itemsize
    max_blk = max(sublane, (device_vmem // 8) // per_row_out_bytes)
    max_blk = (max_blk // sublane) * sublane
    if block_rows is not None:
        max_blk = max(sublane, min(max_blk, _round_up(int(block_rows), sublane)))

    # Aim for >= 4 grid steps so the "parallel" axis can shard across both
    # TensorCores on v7x (and keep the store pipeline deep elsewhere).
    target = _round_up(max(pl.cdiv(rows, 4), 1), sublane)
    blk = max(sublane, min(max_blk, target))

    grid = (pl.cdiv(rows, blk),)

    # --- build inputs (no padding, no trailing slice) ------------------------
    # NOTE: positions are exact in f32 only up to 2^24 — fine for realistic
    # context lengths.
    pos_col = position_ids.reshape(rows, 1).astype(jnp.float32)        # (rows, 1)
    inv_f32 = inv_freq.astype(jnp.float32)
    inv_full = jnp.concatenate([inv_f32, inv_f32]).reshape(1, head_dim)  # (1, D)

    kernel = _make_rope_kernel(attention_scaling)

    # Scoped VMEM: ~2x the double-buffered block working set, clamped to the
    # device's physical VMEM so the same source is safe on v5e/v6e/v7x.
    block_bytes = 2 * 2 * blk * head_dim * out_itemsize          # outputs, 2 bufs
    block_bytes += 2 * (blk * 4 + head_dim * 4)                  # inputs, 2 bufs
    vmem_limit = int(min(device_vmem, max(4 * 1024 * 1024, 2 * block_bytes)))

    out_shape = (
        jax.ShapeDtypeStruct((rows, head_dim), out_dtype),
        jax.ShapeDtypeStruct((rows, head_dim), out_dtype),
    )

    cos_flat, sin_flat = pl.pallas_call(
        kernel,
        out_shape=out_shape,
        grid_spec=pltpu.PrefetchScalarGridSpec(
            num_scalar_prefetch=0,
            grid=grid,
            in_specs=[
                pl.BlockSpec((blk, 1), lambda i: (i, 0)),          # positions
                pl.BlockSpec((1, head_dim), lambda i: (0, 0)),     # inv_freq (const)
            ],
            out_specs=[
                pl.BlockSpec((blk, head_dim), lambda i: (i, 0)),
                pl.BlockSpec((blk, head_dim), lambda i: (i, 0)),
            ],
        ),
        compiler_params=pltpu.CompilerParams(
            dimension_semantics=("parallel",),
            vmem_limit_bytes=vmem_limit,
        ),
    )(pos_col, inv_full)

    cos = cos_flat.reshape(B, S, head_dim)
    sin = sin_flat.reshape(B, S, head_dim)
    return cos, sin


# ---------------------------------------------------------------------------
# reference (plain JAX, mirrors the PyTorch math) for sanity checking
# ---------------------------------------------------------------------------
def mllama_rotary_embedding_ref(x, position_ids, inv_freq, attention_scaling):
    inv_exp = inv_freq[None, :, None].astype(jnp.float32)            # (1, half, 1)
    inv_exp = jnp.broadcast_to(inv_exp, (position_ids.shape[0],) + inv_exp.shape[1:])
    pos_exp = position_ids[:, None, :].astype(jnp.float32)           # (B, 1, S)
    freqs = jnp.matmul(inv_exp, pos_exp).transpose(0, 2, 1)          # (B, S, half)
    emb = jnp.concatenate([freqs, freqs], axis=-1)                   # (B, S, D)
    cos = jnp.cos(emb) * attention_scaling
    sin = jnp.sin(emb) * attention_scaling
    return cos.astype(x.dtype), sin.astype(x.dtype)


if __name__ == "__main__":
    # Small, deterministic config (synthetic MllamaTextConfig-like values).
    # head_dim=128 matches real Mllama (4096 / 32 heads) and gives a
    # lane-dense 128-wide output store.
    head_dim = 128
    rope_theta = 500000.0
    rope_factor = 8.0
    low_freq_factor = 1.0
    high_freq_factor = 4.0
    original_max_position_embeddings = 8192

    inv_freq, attention_scaling = llama3_rope_init(
        head_dim, rope_theta, rope_factor, low_freq_factor,
        high_freq_factor, original_max_position_embeddings,
    )

    key = jax.random.PRNGKey(0)
    kx, kp = jax.random.split(key)

    # --- primary check: B=2, S=8, hidden=32 ---------------------------------
    B, S, hidden = 2, 8, 32
    x = jax.random.normal(kx, (B, S, hidden), dtype=jnp.float32)
    position_ids = jnp.broadcast_to(jnp.arange(S, dtype=jnp.int32)[None, :], (B, S))
    position_ids = position_ids + jnp.array([[0], [3]], dtype=jnp.int32)

    cos, sin = mllama_rotary_embedding(x, position_ids, inv_freq, attention_scaling)
    jax.block_until_ready((cos, sin))

    cos_ref, sin_ref = mllama_rotary_embedding_ref(
        x, position_ids, inv_freq, attention_scaling
    )
    assert cos.shape == (B, S, head_dim) and sin.shape == (B, S, head_dim)
    assert cos.dtype == x.dtype and sin.dtype == x.dtype
    assert jnp.allclose(cos, cos_ref, atol=1e-5, rtol=1e-5)
    assert jnp.allclose(sin, sin_ref, atol=1e-5, rtol=1e-5)

    # --- ragged check: rows not divisible by the row block (masked tail) -----
    B2, S2 = 1, 13
    x2 = jax.random.normal(kp, (B2, S2, hidden), dtype=jnp.bfloat16)
    pos2 = jnp.arange(S2, dtype=jnp.int32)[None, :] + 7
    cos2, sin2 = mllama_rotary_embedding(x2, pos2, inv_freq, attention_scaling)
    jax.block_until_ready((cos2, sin2))
    cos2_ref, sin2_ref = mllama_rotary_embedding_ref(
        x2, pos2, inv_freq, attention_scaling
    )
    assert cos2.shape == (B2, S2, head_dim) and cos2.dtype == jnp.bfloat16
    assert jnp.allclose(cos2.astype(jnp.float32), cos2_ref.astype(jnp.float32),
                        atol=1e-2, rtol=1e-2)
    assert jnp.allclose(sin2.astype(jnp.float32), sin2_ref.astype(jnp.float32),
                        atol=1e-2, rtol=1e-2)

    print("KERNEL_OK")
</pallas_src>

<mosaic_0001>
module attributes {stable_mosaic.version = 11 : i64} {
  func.func @rope_kernel(%arg0: i32, %arg1: memref<8x1xf32, #tpu.memory_space<vmem>>, %arg2: memref<1x128xf32, #tpu.memory_space<vmem>>, %arg3: memref<8x128xf32, #tpu.memory_space<vmem>>, %arg4: memref<8x128xf32, #tpu.memory_space<vmem>>) attributes {dimension_semantics = [#tpu.dimension_semantics<parallel>], iteration_bounds = array<i64: 2>, scalar_prefetch = 0 : i64, scratch_operands = 0 : i64, tpu.core_type = #tpu.core_type<tc>, window_params = [{transform_indices = @transform_0, window_bounds = array<i64: 8, 1>}, {pipeline_mode = #tpu.pipeline_mode<synchronous>, transform_indices = @transform_1, window_bounds = array<i64: 1, 128>}, {transform_indices = @transform_2, window_bounds = array<i64: 8, 128>}, {transform_indices = @transform_3, window_bounds = array<i64: 8, 128>}]} {
    %c0 = arith.constant 0 : index
    %c0_0 = arith.constant 0 : index
    %0 = vector.load %arg1[%c0, %c0_0] : memref<8x1xf32, #tpu.memory_space<vmem>>, vector<8x1xf32>
    %c0_1 = arith.constant 0 : index
    %c0_2 = arith.constant 0 : index
    %1 = vector.load %arg2[%c0_1, %c0_2] : memref<1x128xf32, #tpu.memory_space<vmem>>, vector<1x128xf32>
    %2 = vector.broadcast %0 : vector<8x1xf32> to vector<8x128xf32>
    %3 = vector.broadcast %1 : vector<1x128xf32> to vector<8x128xf32>
    %4 = arith.mulf %2, %3 : vector<8x128xf32>
    %5 = math.cos %4 : vector<8x128xf32>
    %6 = math.sin %4 : vector<8x128xf32>
    %c0_3 = arith.constant 0 : index
    %c0_4 = arith.constant 0 : index
    %7 = vector.load %arg3[%c0_3, %c0_4] : memref<8x128xf32, #tpu.memory_space<vmem>>, vector<8x128xf32>
    tpu.vector_store %arg3[%c0_3, %c0_4], %5 {strides = array<i32>} : memref<8x128xf32, #tpu.memory_space<vmem>>, vector<8x128xf32>,
    %c0_5 = arith.constant 0 : index
    %c0_6 = arith.constant 0 : index
    %8 = vector.load %arg4[%c0_5, %c0_6] : memref<8x128xf32, #tpu.memory_space<vmem>>, vector<8x128xf32>
    tpu.vector_store %arg4[%c0_5, %c0_6], %6 {strides = array<i32>} : memref<8x128xf32, #tpu.memory_space<vmem>>, vector<8x128xf32>,
    return
  }
  func.func @transform_0(%arg0: i32) -> (i32, i32) {
    %c0_i32 = arith.constant 0 : i32
    %c0_i32_0 = arith.constant 0 : i32
    return %arg0, %c0_i32 : i32, i32
  }
  func.func @transform_1(%arg0: i32) -> (i32, i32) {
    %c0_i32 = arith.constant 0 : i32
    %c0_i32_0 = arith.constant 0 : i32
    %c0_i32_1 = arith.constant 0 : i32
    return %c0_i32, %c0_i32_0 : i32, i32
  }
  func.func @transform_2(%arg0: i32) -> (i32, i32) {
    %c0_i32 = arith.constant 0 : i32
    %c0_i32_0 = arith.constant 0 : i32
    return %arg0, %c0_i32 : i32, i32
  }
  func.func @transform_3(%arg0: i32) -> (i32, i32) {
    %c0_i32 = arith.constant 0 : i32
    %c0_i32_0 = arith.constant 0 : i32
    return %arg0, %c0_i32 : i32, i32
  }
}

</mosaic_0001>

<bundles_post_ra>
// kernel: tpu_custom_call.1
= control target key start
LH: loop header
LB: loop body
LE: loop exit
PB: predicated region body
PF: predicated region fallthrough
CT: control target
= control target key end

     0   :  { %9 = vsyncpa [#allocation3], 0  ;;  %s887_s0 = inlined_call_operand.vmem [shape: f32[16,1], index: 0, kind: input, shape index: {}]   ;;  %s888_s1 = inlined_call_operand.vmem [shape: f32[1,128], index: 1, kind: input, shape index: {}]   ;;  %s889_s2 = inlined_call_operand.hbm [shape: f32[16,128], index: 2, kind: output, shape index: {0}]   ;;  %s890_s3 = inlined_call_operand.hbm [shape: f32[16,128], index: 3, kind: output, shape index: {1}]  }
   0x1   :  { %11 = vsyncpa [#allocation3 + $0x1], 0 }
   0x2   :  { %12 = vsyncpa [#allocation5], 0 }
   0x3   :  { %14 = vsyncpa [#allocation5 + $0x1], 0  ;;  %s730_s12 = smov 0   ;;  %s732_s13 = smov 0  }
   0x4   :  { %s734_s14 = smov 0   ;;  %s736_s15 = smov 0  }
   0x5 LB: > { %s751_s16 = sadd.s32 4294967295, %s699_s15   ;;  %s523_s17 = sadd.s32 4294967294, %s699_s15   ;;  %s699_s15 = sphi %s736_s15, %s896_s15   ;;  %s695_s14 = sphi %s734_s14, %s895_s14   ;;  %s691_s13 = sphi %s732_s13, %s894_s13   ;;  %s687_s12 = sphi %s730_s12, %s893_s12  }
   0x6   : > { %s755_s18 = sadd.s32 1, %s699_s15   ;;  %s74_s19 = sadd.s32 1, %s695_s14 }
   0x7   : > { %s71_s20 = ssub.s32 %s699_s15, %s755_s18  ;;  %p84_p0 = scmp.ne.s32.totalorder %s695_s14, %s691_s13 }
   0x8   : > { %p72_p1 = scmp.eq.s32.totalorder %s71_s20, 0  ;;  %p85_p2 = scmp.eq.s32.totalorder %s751_s16, 1 }
   0x9   : > { %p90_p3 = scmp.ne.s32.totalorder %s691_s13, %s687_s12  ;;  %p91_p4 = scmp.eq.s32.totalorder %s523_s17, 1 }
   0xa   : > { %s766_s21 = scalar_select %p72_p1, %s695_s14, %s74_s19  }
   0xb   : > { %p768_p5 = por %p85_p2, %p84_p0  ;;  %p772_p6 = por %p91_p4, %p90_p3 }
   0xc   : > { %p526_p7 = scmp.ge.s32.totalorder %s699_s15, 1  ;;  %p145_p8 = scmp.lt.s32.totalorder %s699_s15, 3 }
   0xe   : > { %p146_p9 = pnand %p526_p7, %p145_p8 }
   0xf   : > { %p173_p10 = scmp.lt.s32.totalorder (!%p146_p9), %s751_s16, 1  ;;  %v701_v0 = vmov (!%p146_p9), 0   ;;  %v530_v2 = vld [vmem:[%s888_s1] ss:$0 sm:$0xff] (!%p146_p9)  ;;  %v702_v15 = vmov (!%p146_p9), 683565275  }
  0x10   : > { %149 = sbr.rel (%p146_p9) target bundleno = 274 (0x112), region = 28  ;;  %600 = vset.pattern.permute.xlu0 (!%p146_p9), %v701_v0  ;;  %v703_v17 = vmov (!%p146_p9), 2475754826   ;;  %v704_v20 = vmov (!%p146_p9), 2131351028   ;;  %s807_s4 = sand.u32 (!%p146_p9), 1, %s691_s13  }
  0x11   : > { %v705_v23 = vmov (!%p146_p9), 2102212464   ;;  %v706_v26 = vmov (!%p146_p9), 920167782   ;;  %v707_v29 = vmov (!%p146_p9), 1326507024  }
  0x12   : > { %s527_s5 = sshll.u32 (!%p146_p9), %s807_s4, 3  ;;  %s541_s6 = sshll.u32 (!%p146_p9), %s751_s16, 7 }
  0x13   : > { %s165_s7 = scalar_lea.vmem (!%p146_p9), [#allocation2], %s527_s5  ;;  %s172_s9 = scalar_lea.vmem (!%p146_p9), [#allocation4], %s527_s5 }
  0x14   : > { %s419_s8 = sshll.u32 (!%p146_p9), %s165_s7, 4  ;;  %s432_s10 = sshll.u32 (!%p146_p9), %s172_s9, 4  ;;  %s817_s8 = int_to_ptr.vmem [resolvable:$true] %s419_s8  ;;  %s824_s10 = int_to_ptr.vmem [resolvable:$true] %s432_s10 }
  0x15   : > { %s814_s19 = scalar_lea.hbm (!%p146_p9), %s889_s2, %s541_s6  ;;  %s605_s26 = scalar_lea.vmem (!%p146_p9), %s817_s8, 128 }
  0x16   : > { %p606_p11 = scmp.ne.s32.totalorder (!%p146_p9), %s817_s8, %s605_s26  ;;  %s708_s27 = smov (!%p146_p9), [#allocation2]  }
  0x17   : > { %s174_s24 = scalar_select %p173_p10, %s751_s16, 1 }
  0x18   : > { %p607_p12 = pnand %p606_p11, %p768_p5 }
  0x19   : > { %s529_s25 = sshll.u32 %s174_s24, 3  ;;  %s822_s24 = scalar_lea.hbm %s890_s3, %s541_s6 }
  0x1a   : > { %s176_s28 = scalar_lea.vmem %s887_s0, %s529_s25  ;;  %s401_s25 = scalar_lea.sflag [#allocation3], %s807_s4 }
  0x1b   : > { %v177_v1 = vld [vmem:[%s176_s28] sm:$0xff]  ;;  %p608_p13 = pneg %p607_p12  ;;  %s609_s28 = sshll.u32 %s708_s27, 4  ;;  %s610_s28 = int_to_ptr.vmem [resolvable:$false] %s609_s28 }
  0x1c   : > { %181 = vperm.xlu0 %600, %v177_v1   ;;  %s611_s29 = scalar_lea.vmem %s610_s28, 256  ;;  %p612_p0 = scmp.lt.s32.totalorder %s817_s8, %s610_s28 }
  0x1d   : > { %p613_p1 = scmp.lt.s32.totalorder %s611_s29, %s605_s26 }
  0x1f   : > { %p614_p2 = por %p613_p1, %p612_p0 }
  0x21   : > { %p615_p3 = pnand %p614_p2, %p608_p13 }
  0x9b   : > { %v182_v3 = vpop.permute.xlu0 %181 }
  0x9c   : > { %v786_v4 = vmul.f32 %v530_v2, %v182_v3 }
  0x9e   : > { %v194_v5 = vand.u32 2139095040, %v786_v4  ;;  %v191_v9 = vand.u32 2147483647, %v786_v4  ;;  %vm193_vm7 = vcmp.lt.s32.totalorder %v786_v4, 0  ;;  %vm283_vm15 = vweird.f32 %v786_v4 }
  0xa0   : > { %v195_v6 = vshrl.u32 %v194_v5, 23  ;;  %v198_v12 = vand.u32 8388607, %v191_v9  ;;  %vm192_vm8 = vcmp.le.f32.partialorder %v191_v9, 0.7853982 }
  0xa2   : > { %v531_v7 = vadd.s32 4294967169, %v195_v6  ;;  %v199_v31 = vor.u32 8388608, %v198_v12 }
  0xa4   : > { %v201_v8 = vadd.s32 1, %v531_v7  ;;  %v239_v45 = vshll.u32 %v199_v31, 8 }
  0xa6   : > { %vm202_vm0 = vcmp.gt.s32.totalorder %v201_v8, 0 }
  0xa7   : > { %v203_v10 = vsel %vm202_vm0, %v201_v8, 0 }
  0xa8   : > { %v205_v11 = vand.u32 31, %v203_v10  ;;  %v204_v14 = vshrl.u32 %v203_v10, 5 }
  0xaa   : > { %v206_v13 = vsub.s32 32, %v205_v11  ;;  %v208_v16 = vshll.u32 %v702_v15, %v205_v11  ;;  %v211_v18 = vshll.u32 %v703_v17, %v205_v11  ;;  %v214_v22 = vshll.u32 %v704_v20, %v205_v11 }
  0xab   : > { %v217_v25 = vshll.u32 %v705_v23, %v205_v11  ;;  %v220_v28 = vshll.u32 %v706_v26, %v205_v11  ;;  %vm223_vm1 = vcmp.lt.s32.totalorder %v204_v14, 1  ;;  %vm226_vm2 = vcmp.lt.s32.totalorder %v204_v14, 4 }
  0xac   : > { %v209_v19 = vshrl.u32 %v703_v17, %v206_v13  ;;  %v212_v21 = vshrl.u32 %v704_v20, %v206_v13  ;;  %v215_v24 = vshrl.u32 %v705_v23, %v206_v13  ;;  %v218_v27 = vshrl.u32 %v706_v26, %v206_v13 }
  0xad   : > { %v221_v30 = vshrl.u32 %v707_v29, %v206_v13  ;;  %v207_v40 = vshrl.u32 %v702_v15, %v206_v13  ;;  %vm225_vm3 = vcmp.lt.s32.totalorder %v204_v14, 3  ;;  %vm224_vm4 = vcmp.lt.s32.totalorder %v204_v14, 2 }
  0xae   : > { %v210_v32 = vor.u32 %v209_v19, %v208_v16  ;;  %v213_v33 = vor.u32 %v212_v21, %v211_v18  ;;  %v216_v34 = vor.u32 %v215_v24, %v214_v22  ;;  %v219_v35 = vor.u32 %v218_v27, %v217_v25 }
  0xaf   : > { %v222_v36 = vor.u32 %v221_v30, %v220_v28 }
  0xb0   : > { %v228_v37 = vsel %vm226_vm2, %v216_v34, 2102212464  ;;  %v231_v38 = vsel %vm223_vm1, %v210_v32, %v213_v33  ;;  %v235_v39 = vsel %vm223_vm1, %v213_v33, %v216_v34  ;;  %v232_v41 = vsel %vm226_vm2, %v219_v35, 920167782 }
  0xb1   : > { %v236_v42 = vsel %vm226_vm2, %v222_v36, 1326507024  ;;  %v233_v43 = vsel %vm225_vm3, %v216_v34, %v232_v41  ;;  %v227_v46 = vsel %vm223_vm1, %v207_v40, %v210_v32  ;;  %v229_v47 = vsel %vm225_vm3, %v213_v33, %v228_v37 }
  0xb2   : > { %v237_v44 = vsel %vm225_vm3, %v219_v35, %v236_v42  ;;  %v234_v48 = vsel %vm224_vm4, %v231_v38, %v233_v43  ;;  %v230_v54 = vsel %vm224_vm4, %v227_v46, %v229_v47 }
  0xb3   : > { %v238_v49 = vsel %vm224_vm4, %v235_v39, %v237_v44  ;;  %v795_v52 = vmul.u32.u64.low %v239_v45, %v234_v48  ;;  %v796_v53 = vmul.u32.u64.high %v239_v45, %v234_v48, %v795_v52  ;;  %v246_v56 = vmul.u32 %v239_v45, %v230_v54 }
  0xb4   : > { %v792_v50 = vmul.u32.u64.low %v239_v45, %v238_v49  ;;  %v793_v51 = vmul.u32.u64.high %v239_v45, %v238_v49, %v792_v50 }
  0xb5   : > { %v249_v55 = vadd.s32 1, %v796_v53 }
  0xb6   : > { %vm248_vm5 = vc.u32 %v793_v51, %v795_v52  ;;  %v247_v5 = vadd.s32 %v795_v52, %v793_v51 }
  0xb7   : > { %v250_v57 = vsel %vm248_vm5, %v249_v55, %v796_v53 }
  0xb8   : > { %v251_v58 = vadd.s32 %v250_v57, %v246_v56 }
  0xba   : > { %v252_v59 = vadd.s32 536870912, %v251_v58 }
  0xbc   : > { %v253_v60 = vshrl.u32 %v252_v59, 30 }
  0xbe   : > { %v254_v61 = vshll.u32 %v253_v60, 30  ;;  %v277_v18 = vsub.s32 4, %v253_v60 }
  0xc0   : > { %v255_v62 = vsub.s32 %v251_v58, %v254_v61  ;;  %v278_v21 = vsel %vm193_vm7, %v277_v18, %v253_v60 }
  0xc1   : > { %v280_v23 = vsel %vm192_vm8, 0, %v278_v21 }
  0xc2   : > { %v257_v63 = vsub.s32 0, %v255_v62  ;;  %v387_v24 = vadd.s32 3, %v280_v23  ;;  %v284_v25 = vand.u32 3, %v280_v23 }
  0xc4   : > { %v532_v0 = vmin.u32 %v257_v63, %v255_v62  ;;  %v388_v26 = vand.u32 3, %v387_v24  ;;  %vm289_vm9 = vcmp.eq.s32.totalorder %v284_v25, 2  ;;  %vm286_vm11 = vcmp.eq.s32.totalorder %v284_v25, 0 }
  0xc5   : > { %vm285_vm13 = vcmp.lt.s32.totalorder %v284_v25, 2 }
  0xc6   : > { %v259_v1 = vclz %v532_v0  ;;  %vm393_vm10 = vcmp.eq.s32.totalorder %v388_v26, 2  ;;  %vm390_vm12 = vcmp.eq.s32.totalorder %v388_v26, 0  ;;  %vm389_vm14 = vcmp.lt.s32.totalorder %v388_v26, 2 }
  0xc8   : > { %v533_v2 = vadd.s32 4294967294, %v259_v1 }
  0xca   : > { %vm534_vm6 = vcmp.lt.s32.totalorder %v533_v2, 0 }
  0xcb   : > { %v262_v3 = vsel %vm534_vm6, 0, %v533_v2 }
  0xcc   : > { %v263_v6 = vsub.s32 32, %v262_v3  ;;  %v267_v7 = vsub.s32 4294967266, %v262_v3  ;;  %v264_v8 = vshll.u32 %v255_v62, %v262_v3 }
  0xce   : > { %v265_v10 = vshrl.u32 %v247_v5, %v263_v6  ;;  %v268_v11 = vadd.s32 127, %v267_v7 }
  0xd0   : > { %v266_v12 = vor.u32 %v265_v10, %v264_v8  ;;  %v269_v13 = vshll.u32 %v268_v11, 23 }
  0xd2   : > { %v270_v14 = vor.u32 4788187, %v269_v13  ;;  %v273_v16 = vcvt.s32.f32 %v266_v12 }
  0xd4   : > { %v271_v15 = vand.u32 2147483647, %v270_v14 }
  0xd6   : > { %v274_v17 = vmul.f32 %v273_v16, %v271_v15 }
  0xd8   : > { %v275_v19 = vxor.u32 2147483648, %v274_v17 }
  0xda   : > { %v276_v20 = vsel %vm193_vm7, %v275_v19, %v274_v17 }
  0xdb   : > { %v279_v22 = vsel %vm192_vm8, %v786_v4, %v276_v20 }
  0xdc   : > { %601 = vcosq.f32 %v279_v22 }
  0xdd   : > { %603 = vsinq.f32 %v279_v22 }
  0xe6   : > { %v602_v27 = vpop.eup %601 }
  0xe7   : > { %v604_v28 = vpop.eup %603  ;;  %v290_v29 = vxor.u32 2147483648, %v602_v27 }
  0xe8   : > { %v287_v30 = vxor.u32 2147483648, %v604_v28 }
  0xe9   : > { %v291_v9 = vsel %vm289_vm9, %v290_v29, %v604_v28  ;;  %v395_v31 = vsel %vm393_vm10, %v290_v29, %v604_v28 }
  0xea   : > { %v288_v32 = vsel %vm286_vm11, %v602_v27, %v287_v30  ;;  %v392_v33 = vsel %vm390_vm12, %v602_v27, %v287_v30 }
  0xeb   : > { %v292_v34 = vsel %vm285_vm13, %v288_v32, %v291_v9  ;;  %v396_v35 = vsel %vm389_vm14, %v392_v33, %v395_v31 }
  0xec   : > { %v293_v36 = vsel %vm283_vm15, nan, %v292_v34  ;;  %v397_v37 = vsel %vm283_vm15, nan, %v396_v35 }
  0xed   : > { %398 = vst [vmem:[%s165_s7] sm:$0xff] %v293_v36  ;;  %399 = vst [vmem:[%s172_s9] sm:$0xff] %v397_v37 }
  0xee   : > { %618 = shalt.err (!%p615_p3)
}
  0xef   : > { %s619_s30 = scalar_lea.hbm %s814_s19, 128  ;;  %s623_s7 = scalar_lea.hbm %s889_s2, 256 }
  0xf0   : > { %p620_p4 = scmp.ne.s32.totalorder %s814_s19, %s619_s30  ;;  %p624_p9 = scmp.lt.u32.totalorder %s814_s19, %s889_s2 }
  0xf1   : > { %p625_p10 = scmp.lt.u32.totalorder %s623_s7, %s619_s30  ;;  %p627_p12 = scmp.lt.u32.totalorder %s619_s30, %s814_s19 }
  0xf2   : > { %p621_p7 = pnand %p620_p4, %p768_p5 }
  0xf3   : > { %p626_p11 = por %p625_p10, %p624_p9 }
  0xf4   : > { %p622_p8 = pneg %p621_p7 }
  0xf5   : > { %p628_p13 = por %p627_p12, %p626_p11 }
  0xf7   : > { %p629_p0 = pnand %p628_p13, %p622_p8 }
  0xf9   : > { %632 = shalt.err (!%p629_p0)
}
  0xfa   : > { %549 = dma.vmem_to_hbm [thread:$0]  (%p768_p5), %s817_s8, 128, %s814_s19, %s401_s25  }
  0xfb   : > { %s406_s17 = scalar_lea.sflag [#allocation5], %s807_s4  ;;  %s633_s16 = scalar_lea.vmem %s824_s10, 128 }
  0xfc   : > { %p634_p1 = scmp.ne.s32.totalorder %s824_s10, %s633_s16  ;;  %s709_s20 = smov [#allocation4]  }
  0xfd   : > { %s637_s26 = sshll.u32 %s709_s20, 4  ;;  %s638_s26 = int_to_ptr.vmem [resolvable:$false] %s637_s26 }
  0xfe   : > { %p635_p2 = pnand %p634_p1, %p768_p5  ;;  %s639_s27 = scalar_lea.vmem %s638_s26, 256 }
  0xff   : > { %p640_p4 = scmp.lt.s32.totalorder %s824_s10, %s638_s26  ;;  %p641_p7 = scmp.lt.s32.totalorder %s639_s27, %s633_s16 }
 0x100   : > { %p636_p3 = pneg %p635_p2 }
 0x101   : > { %p642_p8 = por %p641_p7, %p640_p4 }
 0x103   : > { %p643_p9 = pnand %p642_p8, %p636_p3 }
 0x105   : > { %646 = shalt.err (!%p643_p9)
}
 0x106   : > { %s647_s4 = scalar_lea.hbm %s822_s24, 128  ;;  %s651_s25 = scalar_lea.hbm %s890_s3, 256 }
 0x107   : > { %p648_p10 = scmp.ne.s32.totalorder %s822_s24, %s647_s4  ;;  %p652_p13 = scmp.lt.u32.totalorder %s822_s24, %s890_s3 }
 0x108   : > { %p653_p0 = scmp.lt.u32.totalorder %s651_s25, %s647_s4  ;;  %p655_p2 = scmp.lt.u32.totalorder %s647_s4, %s822_s24 }
 0x109   : > { %p649_p11 = pnand %p648_p10, %p768_p5 }
 0x10a   : > { %p654_p1 = por %p653_p0, %p652_p13 }
 0x10b   : > { %p650_p12 = pneg %p649_p11 }
 0x10c   : > { %p656_p3 = por %p655_p2, %p654_p1 }
 0x10e   : > { %p657_p4 = pnand %p656_p3, %p650_p12 }
 0x110   : > { %660 = shalt.err (!%p657_p4)
}
 0x111   : > { %550 = dma.vmem_to_hbm [thread:$0]  (%p768_p5), %s824_s10, 128, %s822_s24, %s406_s17  }
 0x112 PF: > { %p560_p7 = scmp.ge.s32.totalorder %s699_s15, 2  ;;  %s444_s30 = sand.u32 1, %s687_s12  }
 0x113   : > { %s445_s5 = scalar_lea.sflag [#allocation3], %s444_s30 }
 0x114   : > { %p554_p8 = pnand %p560_p7, %p772_p6 }
 0x116   : > { %678 = dma.done.wait (!%p554_p8), %s445_s5, 128  }
 0x117   : > { %680 = vsyncadd (!%p554_p8), %s445_s5, 4294967168  ;;  %s454_s6 = scalar_lea.sflag [#allocation5], %s444_s30 }
 0x118   : > { %682 = dma.done.wait (!%p554_p8), %s454_s6, 128  }
 0x119   : > { %684 = vsyncadd (!%p554_p8), %s454_s6, 4294967168  ;;  %p17_p5 = scmp.ge.s32.totalorder %s755_s18, 4   ;;  %s893_s12 = smov %s691_s13 }
 0x11a   : > { %s894_s13 = smov %s695_s14  ;;  %s895_s14 = smov %s766_s21 }
 0x11b   : > { %s896_s15 = smov %s755_s18  ;;  %19 = sbr.rel (!%p17_p5) target bundleno = 5 (0x5), region = 80 }
 0x122   :  { %459 = vsyncpa [#allocation3], 1 }
 0x123   :  { %461 = vsyncpa [#allocation3 + $0x1], 1 }
 0x124   :  { %462 = vsyncpa [#allocation5], 1 }
 0x125   :  { %464 = vsyncpa [#allocation5 + $0x1], 1 }

</bundles_post_ra>
